<compile_context>
chip_gen: v7x
topology: tpu7x:2x2x1
jax: 0.10.0
libtpu: 0.0.40
codegen_flags: <defaults>
</compile_context>

<pallas_src>
import jax
import jax.numpy as jnp
from jax import lax
from jax.experimental import pallas as pl
from jax.experimental.pallas import tpu as pltpu


def _round_up(x, m):
    return ((x + m - 1) // m) * m


def _attn_kernel(q_ref, k_ref, v_ref, bias_ref, o_ref, m_s, l_s, acc_s):
    """One (q tile, kv tile) flash-attention step with online softmax.

    q_ref:    (blk_q,  d_pad) bf16, pre-scaled by 1/sqrt(d_out)
    k_ref:    (blk_kv, d_pad) bf16, mean-centered along the sequence
    v_ref:    (blk_kv, d_pad) bf16
    bias_ref: (1, blk_kv)     f32, 0 for real keys / -1e30 for padded keys
    o_ref:    (blk_q,  d_pad) output tile
    m_s/l_s/acc_s: f32 online-softmax state, resident across the kv grid axis.
    """
    kv_idx = pl.program_id(1)

    @pl.when(kv_idx == 0)
    def _init():
        m_s[...] = jnp.full(m_s.shape, -jnp.inf, dtype=m_s.dtype)
        l_s[...] = jnp.zeros(l_s.shape, dtype=l_s.dtype)
        acc_s[...] = jnp.zeros(acc_s.shape, dtype=acc_s.dtype)

    # Scores: contract the feature dims directly (no explicit k.T). bf16 MXU
    # operands, f32 accumulation.
    s = lax.dot_general(
        q_ref[...], k_ref[...],
        dimension_numbers=(((1,), (1,)), ((), ())),
        preferred_element_type=jnp.float32,
    )                                            # (blk_q, blk_kv) f32
    s = s + bias_ref[...]                        # key-padding mask: broadcast add

    # Online (streaming) softmax update, all state in f32.
    m_prev = m_s[...]
    m_new = jnp.maximum(m_prev, jnp.max(s, axis=-1, keepdims=True))
    alpha = jnp.exp(m_prev - m_new)
    p = jnp.exp(s - m_new)                       # f32; cast to bf16 only at the MXU
    l_s[...] = alpha * l_s[...] + jnp.sum(p, axis=-1, keepdims=True)
    acc_s[...] = alpha * acc_s[...] + jnp.dot(
        p.astype(jnp.bfloat16), v_ref[...], preferred_element_type=jnp.float32)
    m_s[...] = m_new

    # Finalize with an EXACT divide (the approx reciprocal caused the previous
    # accuracy failure and saved nothing: it runs once per q tile on (blk_q,1)).
    @pl.when(kv_idx == pl.num_programs(1) - 1)
    def _finalize():
        o_ref[...] = (acc_s[...] / l_s[...]).astype(o_ref.dtype)


def self_attention_v1(x, w_query, w_key, w_value, *, block_q=256, block_kv=512):
    """softmax((x Wq)(x Wk)^T / sqrt(d_out)) @ (x Wv) as a Pallas flash kernel."""
    seq_len, d_in = x.shape
    d_out = w_query.shape[-1]
    assert w_key.shape == (d_in, d_out) and w_value.shape == (d_in, d_out)

    f32 = jnp.float32
    scale = 1.0 / (float(d_out) ** 0.5)

    # ---- Projections once, in the wrapper (reviewer Option A). ----
    q = (x.astype(f32) @ w_query.astype(f32)) * scale    # scale folded into Q
    k = x.astype(f32) @ w_key.astype(f32)
    v = x.astype(f32) @ w_value.astype(f32)
    # Softmax is invariant to a per-query-row constant, so mean-centering K
    # along the sequence changes nothing mathematically but shrinks the
    # magnitudes the bf16 cast sees, keeping exp() accurate.
    k = k - jnp.mean(k, axis=0, keepdims=True)

    # ---- Tiling: lane-dense d_pad; q / kv extents padded independently. ----
    d_pad = _round_up(d_out, 128)
    seq8 = _round_up(seq_len, 8)
    blk_q = min(_round_up(block_q, 8), seq8)
    if seq8 <= _round_up(block_kv, 8):
        blk_kv = seq8                       # single kv tile covers the sequence
    else:
        blk_kv = _round_up(block_kv, 128)   # keep the mask/score lane dim aligned
    s_pad_q = _round_up(seq_len, blk_q)
    s_pad_kv = _round_up(seq_len, blk_kv)
    n_q, n_kv = s_pad_q // blk_q, s_pad_kv // blk_kv

    def pad_cast(a, rows, dtype):
        out = jnp.zeros((rows, d_pad), dtype)
        return out.at[: a.shape[0], : a.shape[1]].set(a.astype(dtype))

    # bf16 MXU operands (f32 accumulation in-kernel); padded rows/cols are zero.
    q_p = pad_cast(q, s_pad_q, jnp.bfloat16)
    k_p = pad_cast(k, s_pad_kv, jnp.bfloat16)
    v_p = pad_cast(v, s_pad_kv, jnp.bfloat16)

    # Additive key-padding mask (0 for real keys, -1e30 for padded keys).
    kv_bias = jnp.where(jnp.arange(s_pad_kv) < seq_len, 0.0, -1e30)
    kv_bias = kv_bias.astype(f32).reshape(1, s_pad_kv)

    # Deeper buffering on the kv streams only when there are enough kv steps.
    kv_pipe = dict(pipeline_mode=pl.Buffered(3)) if n_kv > 2 else {}

    # VMEM budget from the actual working set (2x headroom), capped for v7x.
    n_kv_bufs = 3 if n_kv > 2 else 2
    working_set = (
        2 * blk_q * d_pad * 2                   # q tile (bf16, double buffered)
        + 2 * n_kv_bufs * blk_kv * d_pad * 2    # k + v tiles (bf16)
        + n_kv_bufs * blk_kv * 4                # mask bias row
        + 2 * blk_q * d_pad * 4                 # output tile (double buffered)
        + blk_q * d_pad * 4 + 2 * blk_q * 4     # acc / m / l scratch
        + 2 * blk_q * blk_kv * 4                # score + p temporaries
    )
    vmem_limit = int(min(max(2 * working_set, 8 * 1024 * 1024), 48 * 1024 * 1024))

    out_padded = pl.pallas_call(
        _attn_kernel,
        out_shape=jax.ShapeDtypeStruct((s_pad_q, d_pad), x.dtype),
        grid_spec=pltpu.PrefetchScalarGridSpec(
            num_scalar_prefetch=0,
            grid=(n_q, n_kv),
            in_specs=[
                pl.BlockSpec((blk_q, d_pad), lambda qi, ki: (qi, 0)),              # Q
                pl.BlockSpec((blk_kv, d_pad), lambda qi, ki: (ki, 0), **kv_pipe),  # K
                pl.BlockSpec((blk_kv, d_pad), lambda qi, ki: (ki, 0), **kv_pipe),  # V
                pl.BlockSpec((1, blk_kv), lambda qi, ki: (0, ki)),                 # mask
            ],
            out_specs=pl.BlockSpec((blk_q, d_pad), lambda qi, ki: (qi, 0)),
            scratch_shapes=[
                pltpu.VMEM((blk_q, 1), jnp.float32),      # running max m
                pltpu.VMEM((blk_q, 1), jnp.float32),      # running denominator l
                pltpu.VMEM((blk_q, d_pad), jnp.float32),  # output accumulator
            ],
        ),
        compiler_params=pltpu.CompilerParams(
            dimension_semantics=("parallel", "arbitrary"),
            vmem_limit_bytes=vmem_limit,
        ),
    )(q_p, k_p, v_p, kv_bias)

    return out_padded[:seq_len, :d_out]


def self_attention_v1_ref(x, w_query, w_key, w_value):
    # Pure-JAX reference mirroring the PyTorch forward exactly (f32).
    keys = x @ w_key
    values = x @ w_value
    queries = x @ w_query
    attn_scores = queries @ keys.T
    attn_weights = jax.nn.softmax(attn_scores / keys.shape[-1] ** 0.5, axis=-1)
    return attn_weights @ values


if __name__ == "__main__":
    key = jax.random.PRNGKey(0)
    k_x, k_q, k_k, k_v = jax.random.split(key, 4)

    # Toy size implied by the module (torch.rand inputs): seq=8, d_in=16, d_out=32.
    seq_len, d_in, d_out = 8, 16, 32
    x = jax.random.uniform(k_x, (seq_len, d_in), dtype=jnp.float32)
    w_query = jax.random.uniform(k_q, (d_in, d_out), dtype=jnp.float32)
    w_key = jax.random.uniform(k_k, (d_in, d_out), dtype=jnp.float32)
    w_value = jax.random.uniform(k_v, (d_in, d_out), dtype=jnp.float32)

    out = jax.block_until_ready(self_attention_v1(x, w_query, w_key, w_value))
    ref = self_attention_v1_ref(x, w_query, w_key, w_value)
    assert out.shape == (seq_len, d_out)
    err = float(jnp.max(jnp.abs(out - ref)))
    # bf16 MXU operands with f32 accumulation -> ~1e-2-relative tolerance.
    assert jnp.allclose(out, ref, atol=5e-2, rtol=2e-2), err

    # Larger case: multi-q-tile grid, feature-dim padding, ragged sequence.
    k_x2, k_q2, k_k2, k_v2 = jax.random.split(jax.random.PRNGKey(1), 4)
    s2, di2, do2 = 300, 24, 96
    x2 = jax.random.uniform(k_x2, (s2, di2), dtype=jnp.float32)
    wq2 = jax.random.uniform(k_q2, (di2, do2), dtype=jnp.float32)
    wk2 = jax.random.uniform(k_k2, (di2, do2), dtype=jnp.float32)
    wv2 = jax.random.uniform(k_v2, (di2, do2), dtype=jnp.float32)
    ref2 = self_attention_v1_ref(x2, wq2, wk2, wv2)

    out2 = jax.block_until_ready(self_attention_v1(x2, wq2, wk2, wv2))
    assert out2.shape == (s2, do2)
    err2 = float(jnp.max(jnp.abs(out2 - ref2)))
    assert jnp.allclose(out2, ref2, atol=5e-2, rtol=2e-2), err2

    # Same data through a multi-kv-tile grid: exercises the online softmax
    # across kv steps, the key-padding mask, and the Buffered(3) kv streams.
    out3 = jax.block_until_ready(
        self_attention_v1(x2, wq2, wk2, wv2, block_q=128, block_kv=128))
    err3 = float(jnp.max(jnp.abs(out3 - ref2)))
    assert jnp.allclose(out3, ref2, atol=5e-2, rtol=2e-2), err3

    print("KERNEL_OK")
</pallas_src>

<mosaic_0001>
module attributes {stable_mosaic.version = 11 : i64} {
  func.func @_attn_kernel(%arg0: i32, %arg1: i32, %arg2: memref<8x128xbf16, #tpu.memory_space<vmem>>, %arg3: memref<8x128xbf16, #tpu.memory_space<vmem>>, %arg4: memref<8x128xbf16, #tpu.memory_space<vmem>>, %arg5: memref<1x8xf32, #tpu.memory_space<vmem>>, %arg6: memref<8x128xf32, #tpu.memory_space<vmem>>, %arg7: memref<8x1xf32, #tpu.memory_space<vmem>>, %arg8: memref<8x1xf32, #tpu.memory_space<vmem>>, %arg9: memref<8x128xf32, #tpu.memory_space<vmem>>) attributes {dimension_semantics = [#tpu.dimension_semantics<parallel>, #tpu.dimension_semantics<arbitrary>], iteration_bounds = array<i64: 1, 1>, scalar_prefetch = 0 : i64, scratch_operands = 3 : i64, tpu.core_type = #tpu.core_type<tc>, window_params = [{transform_indices = @transform_0, window_bounds = array<i64: 8, 128>}, {transform_indices = @transform_1, window_bounds = array<i64: 8, 128>}, {transform_indices = @transform_2, window_bounds = array<i64: 8, 128>}, {transform_indices = @transform_3, window_bounds = array<i64: 1, 8>}, {transform_indices = @transform_4, window_bounds = array<i64: 8, 128>}]} {
    %c0_i32 = arith.constant 0 : i32
    %0 = arith.cmpi eq, %arg1, %c0_i32 : i32
    %1 = arith.extui %0 : i1 to i32
    %c0_i32_0 = arith.constant 0 : i32
    %2 = arith.cmpi ne, %1, %c0_i32_0 : i32
    scf.if %2 {
      %cst_25 = arith.constant 0xFF800000 : f32
      %36 = vector.broadcast %cst_25 : f32 to vector<8x1xf32>
      %c0_26 = arith.constant 0 : index
      %c0_27 = arith.constant 0 : index
      %37 = vector.load %arg7[%c0_26, %c0_27] : memref<8x1xf32, #tpu.memory_space<vmem>>, vector<8x1xf32>
      tpu.vector_store %arg7[%c0_26, %c0_27], %36 {strides = array<i32>} : memref<8x1xf32, #tpu.memory_space<vmem>>, vector<8x1xf32>,
      %cst_28 = arith.constant 0.000000e+00 : f32
      %38 = vector.broadcast %cst_28 : f32 to vector<8x1xf32>
      %c0_29 = arith.constant 0 : index
      %c0_30 = arith.constant 0 : index
      %39 = vector.load %arg8[%c0_29, %c0_30] : memref<8x1xf32, #tpu.memory_space<vmem>>, vector<8x1xf32>
      tpu.vector_store %arg8[%c0_29, %c0_30], %38 {strides = array<i32>} : memref<8x1xf32, #tpu.memory_space<vmem>>, vector<8x1xf32>,
      %cst_31 = arith.constant 0.000000e+00 : f32
      %40 = vector.broadcast %cst_31 : f32 to vector<8x128xf32>
      %c0_32 = arith.constant 0 : index
      %c0_33 = arith.constant 0 : index
      %41 = vector.load %arg9[%c0_32, %c0_33] : memref<8x128xf32, #tpu.memory_space<vmem>>, vector<8x128xf32>
      tpu.vector_store %arg9[%c0_32, %c0_33], %40 {strides = array<i32>} : memref<8x128xf32, #tpu.memory_space<vmem>>, vector<8x128xf32>,
    } else {
    }
    %c0 = arith.constant 0 : index
    %c0_1 = arith.constant 0 : index
    %3 = vector.load %arg2[%c0, %c0_1] : memref<8x128xbf16, #tpu.memory_space<vmem>>, vector<8x128xbf16>
    %c0_2 = arith.constant 0 : index
    %c0_3 = arith.constant 0 : index
    %4 = vector.load %arg3[%c0_2, %c0_3] : memref<8x128xbf16, #tpu.memory_space<vmem>>, vector<8x128xbf16>
    %cst = arith.constant dense<0.000000e+00> : vector<8x8xf32>
    %5 = tpu.matmul %3, %4, %cst {dimension_numbers = #tpu.dot_dimension_numbers<[1], [1], [0], [0], [0, 0, 1, 0], [], []>} : vector<8x128xbf16>, vector<8x128xbf16>, vector<8x8xf32> -> vector<8x8xf32>
    %c0_4 = arith.constant 0 : index
    %c0_5 = arith.constant 0 : index
    %6 = vector.load %arg5[%c0_4, %c0_5] : memref<1x8xf32, #tpu.memory_space<vmem>>, vector<1x8xf32>
    %7 = vector.broadcast %6 : vector<1x8xf32> to vector<8x8xf32>
    %8 = arith.addf %5, %7 : vector<8x8xf32>
    %c0_6 = arith.constant 0 : index
    %c0_7 = arith.constant 0 : index
    %9 = vector.load %arg7[%c0_6, %c0_7] : memref<8x1xf32, #tpu.memory_space<vmem>>, vector<8x1xf32>
    %cst_8 = arith.constant dense<0xFF800000> : vector<8xf32>
    %10 = vector.multi_reduction <maximumf>, %8, %cst_8 [1] : vector<8x8xf32> to vector<8xf32>
    %11 = vector.shape_cast %10 : vector<8xf32> to vector<8x1xf32>
    %12 = arith.maximumf %9, %11 : vector<8x1xf32>
    %13 = arith.subf %9, %12 : vector<8x1xf32>
    %14 = math.exp %13 : vector<8x1xf32>
    %15 = vector.broadcast %12 : vector<8x1xf32> to vector<8x8xf32>
    %16 = arith.subf %8, %15 : vector<8x8xf32>
    %17 = math.exp %16 : vector<8x8xf32>
    %c0_9 = arith.constant 0 : index
    %c0_10 = arith.constant 0 : index
    %18 = vector.load %arg8[%c0_9, %c0_10] : memref<8x1xf32, #tpu.memory_space<vmem>>, vector<8x1xf32>
    %19 = arith.mulf %14, %18 : vector<8x1xf32>
    %cst_11 = arith.constant dense<0.000000e+00> : vector<8xf32>
    %20 = vector.multi_reduction <add>, %17, %cst_11 [1] : vector<8x8xf32> to vector<8xf32>
    %21 = vector.shape_cast %20 : vector<8xf32> to vector<8x1xf32>
    %22 = arith.addf %19, %21 : vector<8x1xf32>
    %c0_12 = arith.constant 0 : index
    %c0_13 = arith.constant 0 : index
    %23 = vector.load %arg8[%c0_12, %c0_13] : memref<8x1xf32, #tpu.memory_space<vmem>>, vector<8x1xf32>
    tpu.vector_store %arg8[%c0_12, %c0_13], %22 {strides = array<i32>} : memref<8x1xf32, #tpu.memory_space<vmem>>, vector<8x1xf32>,
    %c0_14 = arith.constant 0 : index
    %c0_15 = arith.constant 0 : index
    %24 = vector.load %arg9[%c0_14, %c0_15] : memref<8x128xf32, #tpu.memory_space<vmem>>, vector<8x128xf32>
    %25 = vector.broadcast %14 : vector<8x1xf32> to vector<8x128xf32>
    %26 = arith.mulf %25, %24 : vector<8x128xf32>
    %27 = arith.truncf %17 : vector<8x8xf32> to vector<8x8xbf16>
    %c0_16 = arith.constant 0 : index
    %c0_17 = arith.constant 0 : index
    %28 = vector.load %arg4[%c0_16, %c0_17] : memref<8x128xbf16, #tpu.memory_space<vmem>>, vector<8x128xbf16>
    %cst_18 = arith.constant dense<0.000000e+00> : vector<8x128xf32>
    %29 = tpu.matmul %27, %28, %cst_18 {dimension_numbers = #tpu.dot_dimension_numbers<[1], [0], [0], [1], [0, 0, 1, 1], [], []>} : vector<8x8xbf16>, vector<8x128xbf16>, vector<8x128xf32> -> vector<8x128xf32>
    %30 = arith.addf %26, %29 : vector<8x128xf32>
    %c0_19 = arith.constant 0 : index
    %c0_20 = arith.constant 0 : index
    %31 = vector.load %arg9[%c0_19, %c0_20] : memref<8x128xf32, #tpu.memory_space<vmem>>, vector<8x128xf32>
    tpu.vector_store %arg9[%c0_19, %c0_20], %30 {strides = array<i32>} : memref<8x128xf32, #tpu.memory_space<vmem>>, vector<8x128xf32>,
    %c0_21 = arith.constant 0 : index
    %c0_22 = arith.constant 0 : index
    %32 = vector.load %arg7[%c0_21, %c0_22] : memref<8x1xf32, #tpu.memory_space<vmem>>, vector<8x1xf32>
    tpu.vector_store %arg7[%c0_21, %c0_22], %12 {strides = array<i32>} : memref<8x1xf32, #tpu.memory_space<vmem>>, vector<8x1xf32>,
    %c0_i32_23 = arith.constant 0 : i32
    %33 = arith.cmpi eq, %arg1, %c0_i32_23 : i32
    %34 = arith.extui %33 : i1 to i32
    %c0_i32_24 = arith.constant 0 : i32
    %35 = arith.cmpi ne, %34, %c0_i32_24 : i32
    scf.if %35 {
      %c0_25 = arith.constant 0 : index
      %c0_26 = arith.constant 0 : index
      %36 = vector.load %arg9[%c0_25, %c0_26] : memref<8x128xf32, #tpu.memory_space<vmem>>, vector<8x128xf32>
      %c0_27 = arith.constant 0 : index
      %c0_28 = arith.constant 0 : index
      %37 = vector.load %arg8[%c0_27, %c0_28] : memref<8x1xf32, #tpu.memory_space<vmem>>, vector<8x1xf32>
      %38 = vector.broadcast %37 : vector<8x1xf32> to vector<8x128xf32>
      %39 = arith.divf %36, %38 : vector<8x128xf32>
      %c0_29 = arith.constant 0 : index
      %c0_30 = arith.constant 0 : index
      %40 = vector.load %arg6[%c0_29, %c0_30] : memref<8x128xf32, #tpu.memory_space<vmem>>, vector<8x128xf32>
      tpu.vector_store %arg6[%c0_29, %c0_30], %39 {strides = array<i32>} : memref<8x128xf32, #tpu.memory_space<vmem>>, vector<8x128xf32>,
    } else {
    }
    return
  }
  func.func @transform_0(%arg0: i32, %arg1: i32) -> (i32, i32) {
    %c0_i32 = arith.constant 0 : i32
    %c0_i32_0 = arith.constant 0 : i32
    return %arg0, %c0_i32 : i32, i32
  }
  func.func @transform_1(%arg0: i32, %arg1: i32) -> (i32, i32) {
    %c0_i32 = arith.constant 0 : i32
    %c0_i32_0 = arith.constant 0 : i32
    return %arg1, %c0_i32 : i32, i32
  }
  func.func @transform_2(%arg0: i32, %arg1: i32) -> (i32, i32) {
    %c0_i32 = arith.constant 0 : i32
    %c0_i32_0 = arith.constant 0 : i32
    return %arg1, %c0_i32 : i32, i32
  }
  func.func @transform_3(%arg0: i32, %arg1: i32) -> (i32, i32) {
    %c0_i32 = arith.constant 0 : i32
    %c0_i32_0 = arith.constant 0 : i32
    return %c0_i32, %arg1 : i32, i32
  }
  func.func @transform_4(%arg0: i32, %arg1: i32) -> (i32, i32) {
    %c0_i32 = arith.constant 0 : i32
    %c0_i32_0 = arith.constant 0 : i32
    return %arg0, %c0_i32 : i32, i32
  }
}

</mosaic_0001>

<bundles_post_ra>
// kernel: tpu_custom_call.1
= control target key start
LH: loop header
LB: loop body
LE: loop exit
PB: predicated region body
PF: predicated region fallthrough
CT: control target
= control target key end

     0   :  { %9 = vsyncpa [#allocation6], 0  ;;  %s399_s0 = inlined_call_operand.hbm [shape: bf16[8,128], index: 0, kind: input, shape index: {}]   ;;  %s400_s1 = inlined_call_operand.hbm [shape: bf16[8,128], index: 1, kind: input, shape index: {}]   ;;  %s401_s2 = inlined_call_operand.vmem [shape: bf16[8,128], index: 2, kind: input, shape index: {}]   ;;  %s402_s3 = inlined_call_operand.vmem [shape: f32[1,8], index: 3, kind: input, shape index: {}]   ;;  %s403_s4 = inlined_call_operand.hbm [shape: f32[8,128], index: 4, kind: output, shape index: {}]  }
   0x1   :  { %10 = vsyncpa [#allocation9], 0 }
   0x2   :  { %11 = vsyncpa [#allocation7], 0  ;;  %s318_s15 = smov [#allocation5]   ;;  %s319_s17 = smov [#allocation8]  }
   0x3   :  { %s18_s16 = sshll.u32 %s318_s15, 4  ;;  %s28_s18 = sshll.u32 %s319_s17, 4  ;;  %s19_s16 = int_to_ptr.vmem [resolvable:$true] %s18_s16  ;;  %s29_s18 = int_to_ptr.vmem [resolvable:$true] %s28_s18 }
   0x4   :  { %s246_s21 = scalar_lea.hbm %s399_s0, 64 }
   0x5   :  { %p247_p0 = scmp.ne.s32.totalorder %s399_s0, %s246_s21  ;;  %p250_p1 = scmp.lt.u32.totalorder %s246_s21, %s399_s0 }
   0x7   :  { %p252_p2 = pnand %p250_p1, %p247_p0 }
   0x9   :  { %255 = shalt.err (!%p252_p2)
}
   0xa   :  { %s256_s26 = scalar_lea.vmem %s19_s16, 64  ;;  %p261_p4 = scmp.lt.s32.totalorder %s19_s16, %s19_s16 }
   0xb   :  { %p257_p3 = scmp.ne.s32.totalorder %s19_s16, %s256_s26  ;;  %p262_p5 = scmp.lt.s32.totalorder %s256_s26, %s256_s26 }
   0xd   :  { %p263_p6 = por %p262_p5, %p261_p4 }
   0xf   :  { %p264_p7 = pnand %p263_p6, %p257_p3 }
  0x11   :  { %267 = shalt.err (!%p264_p7)
}
  0x12   :  { %21 = dma.hbm_to_vmem [thread:$0]  %s399_s0, 64, %s19_s16, [#allocation6]  }
  0x13   :  { %s268_s5 = scalar_lea.hbm %s400_s1, 64 }
  0x14   :  { %p269_p8 = scmp.ne.s32.totalorder %s400_s1, %s268_s5  ;;  %p272_p9 = scmp.lt.u32.totalorder %s268_s5, %s400_s1 }
  0x16   :  { %p274_p10 = pnand %p272_p9, %p269_p8 }
  0x18   :  { %277 = shalt.err (!%p274_p10)
}
  0x19   :  { %s278_s10 = scalar_lea.vmem %s29_s18, 64  ;;  %p283_p12 = scmp.lt.s32.totalorder %s29_s18, %s29_s18 }
  0x1a   :  { %p279_p11 = scmp.ne.s32.totalorder %s29_s18, %s278_s10  ;;  %p284_p13 = scmp.lt.s32.totalorder %s278_s10, %s278_s10 }
  0x1c   :  { %p285_p0 = por %p284_p13, %p283_p12 }
  0x1e   :  { %p286_p1 = pnand %p285_p0, %p279_p11 }
  0x20   :  { %289 = shalt.err (!%p286_p1)
}
  0x21   :  { %31 = dma.hbm_to_vmem [thread:$0]  %s400_s1, 64, %s29_s18, [#allocation9]  }
  0x22   :  { %312 = dma.done.wait [#allocation6], 64  }
  0x23   :  { %313 = vsyncadd [#allocation6], 4294967232 }
  0x24   :  { %314 = dma.done.wait [#allocation9], 64  }
  0x25   :  { %315 = vsyncadd [#allocation9], 4294967232  ;;  %vm47_vm0 = vcmask 7168   ;;  %v320_v0 = vmov 0.0   ;;  %vm321_vm1 = vmmov 0   ;;  %v322_v3 = vmov -inf  }
  0x26   :  { %49 = vst.msk [vmem:[#allocation3] sm:$0xff] %vm47_vm0, %v320_v0  ;;  %219 = vmatprep.subr.bf16.mxu0 %v320_v0  ;;  %221 = vmatprep.mubr.msk.bf16.mxu0 %vm321_vm1, %v320_v0  ;;  %v52_v1 = vld [vmem:[#allocation8] sm:$0xf]  ;;  %v51_v2 = vld [vmem:[#allocation5] sm:$0xf]  ;;  %48 = vst.msk [vmem:[#allocation2] sm:$0xff] %vm47_vm0, %v322_v3 }
  0x27   :  { %225 = vmatprep.subr.bf16.mxu1 %v320_v0  ;;  %227 = vmatprep.mubr.msk.bf16.mxu1 %vm321_vm1, %v320_v0  ;;  %v213_v4 = vld [vmem:[%s402_s3] ss:$0 sm:$0xff]  ;;  %vm101_vm2 = vcmask 64512   ;;  %v323_v11 = vmov 0   ;;  %vm137_vm3 = vcmask 1043456  }
  0x28   :  { %220 = vmatpush3.bf16.xpose.msra.mxu0 %v52_v1  ;;  %238 = vset.pattern.permute.xlu0 %v323_v11  ;;  %v133_v16 = vld [vmem:[%s401_s2] sm:$0xf]  ;;  %s324_s2 = smov [#allocation10]  }
  0x29   :  { %239 = vset.pattern.permute.xlu1 %v323_v11  ;;  %v139_v17 = vsel %vm137_vm3, %v133_v16, 0  ;;  %s203_s14 = sshll.u32 %s324_s2, 4  ;;  %s204_s14 = int_to_ptr.vmem [resolvable:$true] %s203_s14 }
  0x2a   :  { %226 = vmatpush3.bf16.msra.mxu1 %v139_v17  ;;  %s290_s15 = scalar_lea.vmem %s204_s14, 128  ;;  %p295_p3 = scmp.lt.s32.totalorder %s204_s14, %s204_s14 }
  0x2b   :  { %p291_p2 = scmp.ne.s32.totalorder %s204_s14, %s290_s15  ;;  %p296_p4 = scmp.lt.s32.totalorder %s290_s15, %s290_s15 }
  0x2d   :  { %v100_v12 = vld [vmem:[#allocation2] sm:$0xff]  ;;  %v117_v26 = vld [vmem:[#allocation3] sm:$0xff]  ;;  %p297_p5 = por %p296_p4, %p295_p3 }
  0x2f   :  { %222 = vmatmul.mubr.bf16.vlgmr.msra.gmra.mrb[0].mxu0 %v51_v2  ;;  %p298_p6 = pnand %p297_p5, %p291_p2 }
 0x102   :  { %v94_v5 = vpop.f32.mrb[0].mxu0 }
 0x103   :  { %v95_v6 = vadd.f32 %v213_v4, %v94_v5  ;;  %v223_v7 = vpop.f32.mrb[1].mxu0 }
 0x104   :  { %v97_v8 = vpop.f32.mrb[2].mxu0 }
 0x105   :  { %v224_v9 = vpop.f32.mrb[3].mxu0  ;;  %v102_v10 = vsel %vm101_vm2, %v95_v6, -inf }
 0x106   :  { %103 = vmax.xlane.f32.xlu0 %v102_v10 }
 0x193   :  { %v104_v13 = vpop.xlane.xlu0 %103 }
 0x194   :  { %v105_v14 = vmax.f32 %v100_v12, %v104_v13 }
 0x196   :  { %v106_v15 = vsub.f32 %v100_v12, %v105_v14  ;;  %183 = vst.msk [vmem:[#allocation2] sm:$0xff] %vm47_vm0, %v105_v14  ;;  %111 = vperm.xlu0 %238, %v105_v14  }
 0x198   :  { %v107_v24 = vmul.f32 1.442695, %v106_v15 }
 0x215   :  { %v112_v18 = vpop.permute.xlu0 %111 }
 0x216   :  { %v114_v19 = vsub.f32 %v95_v6, %v112_v18 }
 0x218   :  { %v115_v20 = vmul.f32 1.442695, %v114_v19 }
 0x21a   :  { %240 = vpow2.f32 %v115_v20 }
 0x21b   :  { %242 = vpow2.f32 %v107_v24 }
 0x224   :  { %v241_v21 = vpop.eup %240 }
 0x225   :  { %v119_v22 = vsel %vm101_vm2, %v241_v21, 0.0  ;;  %v132_v23 = vpack.c.bf16 %v241_v21, %v241_v21  ;;  %v243_v25 = vpop.eup %242 }
 0x226   :  { %120 = vadd.xlane.f32.xlu1 %v119_v22  ;;  %v118_v27 = vmul.f32 %v243_v25, %v117_v26 }
 0x227   :  { %228 = vmatmul.mubr.msk.bf16.vlgmr.msra.gmra.mrb[0].mxu1 %vm101_vm2, %v132_v23 }
 0x2b3   :  { %v121_v28 = vpop.xlane.xlu1 %120 }
 0x2b4   :  { %v122_v29 = vadd.f32 %v121_v28, %v118_v27 }
 0x2b6   :  { %124 = vst.msk [vmem:[#allocation3] sm:$0xff] %vm47_vm0, %v122_v29 }
 0x2bd   :  { %v188_v30 = vld [vmem:[#allocation3] sm:$0xff] }
 0x2be   :  { %191 = vperm.xlu1 %239, %v188_v30  }
 0x2c2   :  { %128 = vperm.xlu1 %239, %v243_v25  }
 0x2fa   :  { %v175_v31 = vpop.f32.mrb[0].mxu1 }
 0x2fb   :  { %v229_v32 = vpop.f32.mrb[1].mxu1 }
 0x2fc   :  { %v178_v33 = vpop.f32.mrb[2].mxu1 }
 0x2fd   :  { %v230_v34 = vpop.f32.mrb[3].mxu1 }
 0x33d   :  { %v192_v35 = vpop.permute.xlu1 %191 }
 0x33e   :  { %244 = vrcp.f32 %v192_v35 }
 0x341   :  { %v129_v36 = vpop.permute.xlu1 %128 }
 0x342   :  { %v131_v37 = vmul.f32 0.0, %v129_v36 }
 0x344   :  { %v181_v38 = vadd.f32 %v175_v31, %v131_v37 }
 0x348   :  { %v245_v39 = vpop.eup %244 }
 0x349   :  { %v195_v40 = vmul.f32 %v245_v39, %v181_v38 }
 0x34b   :  { %196 = vst [vmem:[#allocation10] sm:$0xff] %v195_v40 }
 0x34c   :  { %301 = shalt.err (!%p298_p6)
}
 0x34d   :  { %s302_s18 = scalar_lea.hbm %s403_s4, 128 }
 0x34e   :  { %p303_p7 = scmp.ne.s32.totalorder %s403_s4, %s302_s18  ;;  %p306_p8 = scmp.lt.u32.totalorder %s302_s18, %s403_s4 }
 0x350   :  { %p308_p9 = pnand %p306_p8, %p303_p7 }
 0x352   :  { %311 = shalt.err (!%p308_p9)
}
 0x353   :  { %206 = dma.vmem_to_hbm [thread:$0]  %s204_s14, 128, %s403_s4, [#allocation7]  }
 0x354   :  { %316 = dma.done.wait [#allocation7], 128  }
 0x355   :  { %317 = vsyncadd [#allocation7], 4294967168 }
 0x356   :  { %210 = vsyncpa [#allocation6], 1 }
 0x357   :  { %211 = vsyncpa [#allocation9], 1 }
 0x358   :  { %212 = vsyncpa [#allocation7], 1 }

</bundles_post_ra>
